<compile_context>
chip_gen: v5e
topology: v5e:2x2
jax: 0.10.0
libtpu: 0.0.40
codegen_flags: <defaults>
</compile_context>

<pallas_src>
import functools

import jax
import jax.numpy as jnp
from jax.experimental import pallas as pl
from jax.experimental.pallas import tpu as pltpu


def _round_up(v, m):
    return ((v + m - 1) // m) * m


# ----------------------------- Pallas kernels ------------------------------

def _pconv_kernel(x_ref, wf_ref, o_ref, *, taps, tp, tp_in):
    """Fused SeparableConv2d(C, 2N, k=3, pad=1, stride=1) offset branch.

    x_ref:  (1, Cp, Si)  f32 zero-padded image, flattened row-major (row width Wp)
    wf_ref: (2N, 9*Cp)   bf16 folded weights  wf[o, t*Cp + c] = pw[o,c] * dw[c,t]
    o_ref:  (1, 2N, TP)  f32 offsets, one lane-dense tile of the padded-flat output
    """
    t = pl.program_id(1)
    start = pl.multiple_of(t * tp, 128)
    # One aligned window load; the 9 taps become in-register lane slices.
    window = x_ref[0, :, pl.ds(start, tp_in)]                      # (Cp, tp_in)
    patches = [window[:, off:off + tp] for off in taps]            # 9 x (Cp, tp)
    im2col = jnp.stack(patches, axis=0)                            # (9, Cp, tp)
    im2col = im2col.reshape(len(taps) * window.shape[0], tp)       # (9*Cp, tp)
    o_ref[0] = jnp.dot(wf_ref[...], im2col.astype(jnp.bfloat16),
                       preferred_element_type=jnp.float32)


def _defsample_kernel(xq_ref, g_ref, wf_ref, o_ref):
    """Bilinear 4-corner combine fused with the final separable conv.

    xq_ref: (1, 4, N, Cp, T)  bf16 gathered corner values
    g_ref:  (1, 4, N, 1,  T)  f32 bilinear weights (broadcast over C in-kernel)
    wf_ref: (outc, N*Cp)      bf16 folded weights wf[o, n*Cp+c] = pw[o,c]*dw[c,n]
    o_ref:  (1, outc, T)      f32
    """
    # f32 combine (v5e has no bf16 VALU); bf16 operands feed the MXU below.
    acc = xq_ref[0, 0].astype(jnp.float32) * g_ref[0, 0]           # (N, Cp, T)
    for k in range(1, 4):
        acc = acc + xq_ref[0, k].astype(jnp.float32) * g_ref[0, k]
    n, cp, tl = acc.shape
    rhs = acc.reshape(n * cp, tl).astype(jnp.bfloat16)             # (N*Cp, T)
    o_ref[0] = jnp.dot(wf_ref[...], rhs, preferred_element_type=jnp.float32)


# ----------------------------- wrappers ------------------------------------

def pconv_offsets(x_cp, w_dw, w_pw, n_valid_c):
    """SeparableConv2d(C, O, kernel_size=3, padding=1, stride=1) as one fused
    Pallas call.  x_cp: (B, Cp, H, W) channel-padded input (zeros beyond C);
    w_dw: (C, 3, 3); w_pw: (O, C)."""
    B, Cp, H, W = x_cp.shape
    C = n_valid_c
    O = w_pw.shape[0]
    Hp, Wp = H + 2, W + 2

    TP = min(512, _round_up(Hp * Wp, 128))         # lane-dense spatial tile
    So = _round_up(Hp * Wp, TP)
    halo = _round_up(2 * Wp + 2, 128)              # max tap shift, rounded
    Si = So + halo
    tp_in = TP + halo

    xp = jnp.pad(x_cp, ((0, 0), (0, 0), (1, 1), (1, 1))).reshape(B, Cp, Hp * Wp)
    xp = jnp.pad(xp, ((0, 0), (0, 0), (0, Si - Hp * Wp)))
    taps = tuple(di * Wp + dj for di in range(3) for dj in range(3))

    # Fold depthwise 3x3 into the pointwise 1x1:  wf[o, t*Cp+c] = pw[o,c]*dw[c,t]
    wdp = w_dw.reshape(C, 9)
    wf = jnp.zeros((O, 9, Cp), jnp.float32)
    wf = wf.at[:, :, :C].set(w_pw[:, None, :] * wdp.T[None, :, :])
    wf = wf.reshape(O, 9 * Cp).astype(jnp.bfloat16)

    kern = functools.partial(_pconv_kernel, taps=taps, tp=TP, tp_in=tp_in)
    # TODO(synk): halo-tile the input for large H*W (full padded image per
    # batch is VMEM-resident here; re-derive for v7x's 64 MiB VMEM at real sizes).
    out = pl.pallas_call(
        kern,
        out_shape=jax.ShapeDtypeStruct((B, O, So), jnp.float32),
        grid=(B, So // TP),
        in_specs=[pl.BlockSpec((1, Cp, Si), lambda b, t: (b, 0, 0)),
                  pl.BlockSpec((O, 9 * Cp), lambda b, t: (0, 0))],
        out_specs=pl.BlockSpec((1, O, TP), lambda b, t: (b, 0, t)),
        compiler_params=pltpu.CompilerParams(
            dimension_semantics=("parallel", "parallel"),
            vmem_limit_bytes=64 * 1024 * 1024),
    )(xp, wf)
    # interior extraction: offset[b, o, h, w] lives at flat position h*Wp + w
    out = out[:, :, :Hp * Wp].reshape(B, O, Hp, Wp)[:, :, :H, :W]
    return out


def _deform_sampling_terms(offset, ks, Hp, Wp, stride=1):
    """Mirrors DefC._get_p / clamping / bilinear-weight computation."""
    B, twoN, H, W = offset.shape
    N = twoN // 2
    f32 = jnp.float32
    r = jnp.arange(-(ks - 1) // 2, (ks - 1) // 2 + 1)
    pnx, pny = jnp.meshgrid(r, r, indexing="ij")
    p_n = jnp.concatenate([pnx.reshape(-1), pny.reshape(-1)]
                          ).reshape(1, 2 * N, 1, 1).astype(f32)
    p0x, p0y = jnp.meshgrid(jnp.arange(1, H * stride + 1, stride),
                            jnp.arange(1, W * stride + 1, stride), indexing="ij")
    p_0 = jnp.concatenate([jnp.tile(p0x.reshape(1, 1, H, W), (1, N, 1, 1)),
                           jnp.tile(p0y.reshape(1, 1, H, W), (1, N, 1, 1))],
                          axis=1).astype(f32)
    p = (p_0 + p_n + offset).transpose(0, 2, 3, 1)    # (B, H, W, 2N)

    def clamp_xy(q):
        return jnp.concatenate([jnp.clip(q[..., :N], 0, Hp - 1),
                                jnp.clip(q[..., N:], 0, Wp - 1)], axis=-1)

    q_lt = clamp_xy(jnp.floor(p)).astype(jnp.int32)
    q_rb = clamp_xy(jnp.floor(p) + 1.0).astype(jnp.int32)
    q_lb = jnp.concatenate([q_lt[..., :N], q_rb[..., N:]], axis=-1)
    q_rt = jnp.concatenate([q_rb[..., :N], q_lt[..., N:]], axis=-1)
    pc = clamp_xy(p)

    def g(q, sx, sy):
        qf = q.astype(f32)
        return ((1.0 + sx * (qf[..., :N] - pc[..., :N]))
                * (1.0 + sy * (qf[..., N:] - pc[..., N:])))

    corners = [(q_lt, g(q_lt, 1.0, 1.0)),
               (q_rb, g(q_rb, -1.0, -1.0)),
               (q_lb, g(q_lb, 1.0, -1.0)),
               (q_rt, g(q_rt, -1.0, 1.0))]
    return corners, N


def defc_forward(x, params, ks=3, padding=1, stride=1):
    assert stride == 1  # TODO(synk): strided p_conv / sampling grid not implemented
    B, C, H, W = x.shape
    N = ks * ks
    HW = H * W
    outc = params["c_pw"].shape[0]
    Cp = _round_up(C, 8)                 # sublane-aligned channel count

    # ---- offsets: fused SeparableConv2d(C, 2N, 3, pad=1) (Pallas kernel A) ----
    x_cp = jnp.pad(x, ((0, 0), (0, Cp - C), (0, 0), (0, 0)))
    offset = pconv_offsets(x_cp, params["p_dw"], params["p_pw"], C)  # (B,2N,H,W)

    # ---- bilinear corner indices / weights (small XLA glue) ----
    xpad = jnp.pad(x_cp, ((0, 0), (0, 0), (padding, padding), (padding, padding)))
    Hp, Wp = H + 2 * padding, W + 2 * padding
    corners, _ = _deform_sampling_terms(offset, ks, Hp, Wp, stride)

    # ---- gather the 4 bilinear corners (bf16 halves the dominant HBM stream) ----
    # TODO(synk): move this gather in-kernel (scalar-prefetch index rows +
    # VMEM-resident x_flat) to remove the HBM round trip of the gathered stream.
    x_flat = xpad.reshape(B, Cp, Hp * Wp).astype(jnp.bfloat16)
    xq_list, g_list = [], []
    for q, gw in corners:
        idx = q[..., :N] * Wp + q[..., N:]                          # (B, H, W, N)
        idx = jnp.transpose(idx, (0, 3, 1, 2)).reshape(B, 1, N * HW)
        xq = jnp.take_along_axis(
            x_flat, jnp.broadcast_to(idx, (B, Cp, N * HW)), axis=-1)
        xq_list.append(xq.reshape(B, Cp, N, HW).transpose(0, 2, 1, 3))  # (B,N,Cp,HW)
        g_list.append(jnp.transpose(gw, (0, 3, 1, 2)).reshape(B, N, HW))
    xq4 = jnp.stack(xq_list, axis=1)                      # (B, 4, N, Cp, HW) bf16
    g4 = jnp.stack(g_list, axis=1)[:, :, :, None, :]      # (B, 4, N, 1, HW) f32

    # ---- lane padding + folded separable-conv weights ----
    TILE = min(512, _round_up(HW, 128))
    HWp = _round_up(HW, TILE)
    if HWp != HW:
        xq4 = jnp.pad(xq4, ((0, 0), (0, 0), (0, 0), (0, 0), (0, HWp - HW)))
        g4 = jnp.pad(g4, ((0, 0), (0, 0), (0, 0), (0, 0), (0, HWp - HW)))
    wdc = params["c_dw"].reshape(C, N)
    wf = jnp.zeros((outc, N, Cp), jnp.float32)
    wf = wf.at[:, :, :C].set(params["c_pw"][:, None, :] * wdc.T[None, :, :])
    wf = wf.reshape(outc, N * Cp).astype(jnp.bfloat16)

    out = pl.pallas_call(
        _defsample_kernel,
        out_shape=jax.ShapeDtypeStruct((B, outc, HWp), jnp.float32),
        grid=(B, HWp // TILE),
        in_specs=[pl.BlockSpec((1, 4, N, Cp, TILE), lambda b, t: (b, 0, 0, 0, t)),
                  pl.BlockSpec((1, 4, N, 1, TILE), lambda b, t: (b, 0, 0, 0, t)),
                  pl.BlockSpec((outc, N * Cp), lambda b, t: (0, 0))],
        out_specs=pl.BlockSpec((1, outc, TILE), lambda b, t: (b, 0, t)),
        compiler_params=pltpu.CompilerParams(
            dimension_semantics=("parallel", "parallel"),
            vmem_limit_bytes=64 * 1024 * 1024),
    )(xq4, g4, wf)
    out = out[:, :, :HW].reshape(B, outc, H, W)
    return out, offset


# ----------------------------- references ----------------------------------

def reference_offset(x, params, ks=3):
    B, C, H, W = x.shape
    N = ks * ks
    dw = jax.lax.conv_general_dilated(
        x, params["p_dw"].reshape(C, 1, ks, ks), (1, 1), ((1, 1), (1, 1)),
        feature_group_count=C, dimension_numbers=("NCHW", "OIHW", "NCHW"))
    return jax.lax.conv_general_dilated(
        dw, params["p_pw"].reshape(2 * N, C, 1, 1), (1, 1), "VALID",
        dimension_numbers=("NCHW", "OIHW", "NCHW"))


def reference_from_offset(x, offset, params, ks=3, padding=1, stride=1):
    B, C, H, W = x.shape
    N = ks * ks
    xpad = jnp.pad(x, ((0, 0), (0, 0), (padding, padding), (padding, padding)))
    Hp, Wp = H + 2 * padding, W + 2 * padding
    corners, _ = _deform_sampling_terms(offset, ks, Hp, Wp, stride)
    x_flat = xpad.reshape(B, C, Hp * Wp)

    def gather(q):
        idx = (q[..., :N] * Wp + q[..., N:]).reshape(B, 1, -1)
        idx = jnp.broadcast_to(idx, (B, C, idx.shape[-1]))
        return jnp.take_along_axis(x_flat, idx, axis=-1).reshape(B, C, H, W, N)

    x_off = sum(g[:, None] * gather(q) for q, g in corners)       # (B,C,H,W,N)
    wd = params["c_dw"].reshape(C, N)
    dwo = jnp.einsum("bchwn,cn->bchw", x_off, wd)
    return jnp.einsum("oc,bchw->bohw", params["c_pw"], dwo)


# ----------------------------- main -----------------------------------------

def init_params(key, inc, outc, ks=3):
    N = ks * ks
    k1, k2, k3, k4 = jax.random.split(key, 4)
    return {
        "p_dw": 0.2 * jax.random.normal(k1, (inc, ks, ks), jnp.float32),
        "p_pw": 0.2 * jax.random.normal(k2, (2 * N, inc), jnp.float32),
        "c_dw": 0.2 * jax.random.normal(k3, (inc, ks, ks), jnp.float32),
        "c_pw": 0.2 * jax.random.normal(k4, (outc, inc), jnp.float32),
    }


if __name__ == "__main__":
    key = jax.random.PRNGKey(0)
    kx, kp = jax.random.split(key)
    B, C, H, W, OUTC = 2, 4, 16, 16, 8

    x = jax.random.normal(kx, (B, C, H, W), jnp.float32)
    params = init_params(kp, C, OUTC)

    fwd = jax.jit(defc_forward)
    out, offset = fwd(x, params)
    out = jax.block_until_ready(out)
    offset = jax.block_until_ready(offset)

    off_ref = reference_offset(x, params)
    out_ref = reference_from_offset(x, offset, params)

    assert out.shape == (B, OUTC, H, W)
    # bf16 matmul operands (f32 accumulate) -> loosened tolerances vs f32 refs.
    assert jnp.allclose(offset, off_ref, atol=2e-2, rtol=2e-2), "offset mismatch"
    assert jnp.allclose(out, out_ref, atol=3e-2, rtol=3e-2), "output mismatch"
    print("KERNEL_OK")
</pallas_src>

<mosaic_0001>
module attributes {stable_mosaic.version = 11 : i64} {
  func.func @_pconv_kernel(%arg0: i32, %arg1: i32, %arg2: memref<1x8x512xf32, #tpu.memory_space<vmem>>, %arg3: memref<18x72xbf16, #tpu.memory_space<vmem>>, %arg4: memref<1x18x384xf32, #tpu.memory_space<vmem>>) attributes {dimension_semantics = [#tpu.dimension_semantics<parallel>, #tpu.dimension_semantics<parallel>], iteration_bounds = array<i64: 2, 1>, scalar_prefetch = 0 : i64, scratch_operands = 0 : i64, tpu.core_type = #tpu.core_type<tc>, window_params = [{transform_indices = @transform_0, window_bounds = array<i64: 1, 8, 512>}, {pipeline_mode = #tpu.pipeline_mode<synchronous>, transform_indices = @transform_1, window_bounds = array<i64: 18, 72>}, {transform_indices = @transform_2, window_bounds = array<i64: 1, 18, 384>}]} {
    %c384_i32 = arith.constant 384 : i32
    %0 = arith.muli %arg1, %c384_i32 : i32
    %1 = tpu.assume_multiple %0, 128 : i32
    %c0 = arith.constant 0 : index
    %c0_0 = arith.constant 0 : index
    %2 = arith.index_cast %1 : i32 to index
    %3 = vector.load %arg2[%c0, %c0_0, %2] : memref<1x8x512xf32, #tpu.memory_space<vmem>>, vector<1x8x512xf32>
    %4 = vector.shape_cast %3 : vector<1x8x512xf32> to vector<8x512xf32>
    %5 = vector.extract_strided_slice %4 {offsets = [0, 0], sizes = [8, 384], strides = [1, 1]} : vector<8x512xf32> to vector<8x384xf32>
    %6 = vector.extract_strided_slice %4 {offsets = [0, 1], sizes = [8, 384], strides = [1, 1]} : vector<8x512xf32> to vector<8x384xf32>
    %7 = vector.extract_strided_slice %4 {offsets = [0, 2], sizes = [8, 384], strides = [1, 1]} : vector<8x512xf32> to vector<8x384xf32>
    %8 = vector.extract_strided_slice %4 {offsets = [0, 18], sizes = [8, 384], strides = [1, 1]} : vector<8x512xf32> to vector<8x384xf32>
    %9 = vector.extract_strided_slice %4 {offsets = [0, 19], sizes = [8, 384], strides = [1, 1]} : vector<8x512xf32> to vector<8x384xf32>
    %10 = vector.extract_strided_slice %4 {offsets = [0, 20], sizes = [8, 384], strides = [1, 1]} : vector<8x512xf32> to vector<8x384xf32>
    %11 = vector.extract_strided_slice %4 {offsets = [0, 36], sizes = [8, 384], strides = [1, 1]} : vector<8x512xf32> to vector<8x384xf32>
    %12 = vector.extract_strided_slice %4 {offsets = [0, 37], sizes = [8, 384], strides = [1, 1]} : vector<8x512xf32> to vector<8x384xf32>
    %13 = vector.extract_strided_slice %4 {offsets = [0, 38], sizes = [8, 384], strides = [1, 1]} : vector<8x512xf32> to vector<8x384xf32>
    %14 = vector.shape_cast %5 : vector<8x384xf32> to vector<1x8x384xf32>
    %15 = vector.shape_cast %6 : vector<8x384xf32> to vector<1x8x384xf32>
    %16 = vector.shape_cast %7 : vector<8x384xf32> to vector<1x8x384xf32>
    %17 = vector.shape_cast %8 : vector<8x384xf32> to vector<1x8x384xf32>
    %18 = vector.shape_cast %9 : vector<8x384xf32> to vector<1x8x384xf32>
    %19 = vector.shape_cast %10 : vector<8x384xf32> to vector<1x8x384xf32>
    %20 = vector.shape_cast %11 : vector<8x384xf32> to vector<1x8x384xf32>
    %21 = vector.shape_cast %12 : vector<8x384xf32> to vector<1x8x384xf32>
    %22 = vector.shape_cast %13 : vector<8x384xf32> to vector<1x8x384xf32>
    %23 = tpu.concatenate %14, %15, %16, %17, %18, %19, %20, %21, %22 in 0 : vector<1x8x384xf32>, vector<1x8x384xf32>, vector<1x8x384xf32>, vector<1x8x384xf32>, vector<1x8x384xf32>, vector<1x8x384xf32>, vector<1x8x384xf32>, vector<1x8x384xf32>, vector<1x8x384xf32> -> vector<9x8x384xf32>
    %24 = vector.shape_cast %23 : vector<9x8x384xf32> to vector<72x384xf32>
    %c0_1 = arith.constant 0 : index
    %c0_2 = arith.constant 0 : index
    %25 = vector.load %arg3[%c0_1, %c0_2] : memref<18x72xbf16, #tpu.memory_space<vmem>>, vector<18x72xbf16>
    %26 = arith.truncf %24 : vector<72x384xf32> to vector<72x384xbf16>
    %cst = arith.constant dense<0.000000e+00> : vector<18x384xf32>
    %27 = tpu.matmul %25, %26, %cst {dimension_numbers = #tpu.dot_dimension_numbers<[1], [0], [0], [1], [0, 0, 1, 1], [], []>} : vector<18x72xbf16>, vector<72x384xbf16>, vector<18x384xf32> -> vector<18x384xf32>
    %c0_3 = arith.constant 0 : index
    %c0_4 = arith.constant 0 : index
    %c0_5 = arith.constant 0 : index
    %28 = vector.load %arg4[%c0_3, %c0_4, %c0_5] : memref<1x18x384xf32, #tpu.memory_space<vmem>>, vector<1x18x384xf32>
    %29 = vector.shape_cast %28 : vector<1x18x384xf32> to vector<18x384xf32>
    %30 = vector.shape_cast %27 : vector<18x384xf32> to vector<1x18x384xf32>
    tpu.vector_store %arg4[%c0_3, %c0_4, %c0_5], %30 {strides = array<i32>} : memref<1x18x384xf32, #tpu.memory_space<vmem>>, vector<1x18x384xf32>,
    return
  }
  func.func @transform_0(%arg0: i32, %arg1: i32) -> (i32, i32, i32) {
    %c0_i32 = arith.constant 0 : i32
    %c0_i32_0 = arith.constant 0 : i32
    %c0_i32_1 = arith.constant 0 : i32
    return %arg0, %c0_i32, %c0_i32_0 : i32, i32, i32
  }
  func.func @transform_1(%arg0: i32, %arg1: i32) -> (i32, i32) {
    %c0_i32 = arith.constant 0 : i32
    %c0_i32_0 = arith.constant 0 : i32
    %c0_i32_1 = arith.constant 0 : i32
    return %c0_i32, %c0_i32_0 : i32, i32
  }
  func.func @transform_2(%arg0: i32, %arg1: i32) -> (i32, i32, i32) {
    %c0_i32 = arith.constant 0 : i32
    %c0_i32_0 = arith.constant 0 : i32
    return %arg0, %c0_i32, %arg1 : i32, i32, i32
  }
}

module attributes {stable_mosaic.version = 11 : i64} {
  func.func @_defsample_kernel(%arg0: i32, %arg1: i32, %arg2: memref<1x4x9x8x256xbf16, #tpu.memory_space<vmem>>, %arg3: memref<1x4x9x1x256xf32, #tpu.memory_space<vmem>>, %arg4: memref<8x72xbf16, #tpu.memory_space<vmem>>, %arg5: memref<1x8x256xf32, #tpu.memory_space<vmem>>) attributes {dimension_semantics = [#tpu.dimension_semantics<parallel>, #tpu.dimension_semantics<parallel>], iteration_bounds = array<i64: 2, 1>, scalar_prefetch = 0 : i64, scratch_operands = 0 : i64, tpu.core_type = #tpu.core_type<tc>, window_params = [{transform_indices = @transform_0, window_bounds = array<i64: 1, 4, 9, 8, 256>}, {transform_indices = @transform_1, window_bounds = array<i64: 1, 4, 9, 1, 256>}, {pipeline_mode = #tpu.pipeline_mode<synchronous>, transform_indices = @transform_2, window_bounds = array<i64: 8, 72>}, {transform_indices = @transform_3, window_bounds = array<i64: 1, 8, 256>}]} {
    %c0 = arith.constant 0 : index
    %c0_0 = arith.constant 0 : index
    %c0_1 = arith.constant 0 : index
    %c0_2 = arith.constant 0 : index
    %c0_3 = arith.constant 0 : index
    %0 = vector.load %arg2[%c0, %c0_0, %c0_1, %c0_2, %c0_3] : memref<1x4x9x8x256xbf16, #tpu.memory_space<vmem>>, vector<1x1x9x8x256xbf16>
    %1 = vector.shape_cast %0 : vector<1x1x9x8x256xbf16> to vector<9x8x256xbf16>
    %2 = arith.extf %1 : vector<9x8x256xbf16> to vector<9x8x256xf32>
    %c0_4 = arith.constant 0 : index
    %c0_5 = arith.constant 0 : index
    %c0_6 = arith.constant 0 : index
    %c0_7 = arith.constant 0 : index
    %c0_8 = arith.constant 0 : index
    %3 = vector.load %arg3[%c0_4, %c0_5, %c0_6, %c0_7, %c0_8] : memref<1x4x9x1x256xf32, #tpu.memory_space<vmem>>, vector<1x1x9x1x256xf32>
    %4 = vector.shape_cast %3 : vector<1x1x9x1x256xf32> to vector<9x1x256xf32>
    %5 = vector.broadcast %4 : vector<9x1x256xf32> to vector<9x8x256xf32>
    %6 = arith.mulf %2, %5 : vector<9x8x256xf32>
    %c0_9 = arith.constant 0 : index
    %c1 = arith.constant 1 : index
    %c0_10 = arith.constant 0 : index
    %c0_11 = arith.constant 0 : index
    %c0_12 = arith.constant 0 : index
    %7 = vector.load %arg2[%c0_9, %c1, %c0_10, %c0_11, %c0_12] : memref<1x4x9x8x256xbf16, #tpu.memory_space<vmem>>, vector<1x1x9x8x256xbf16>
    %8 = vector.shape_cast %7 : vector<1x1x9x8x256xbf16> to vector<9x8x256xbf16>
    %9 = arith.extf %8 : vector<9x8x256xbf16> to vector<9x8x256xf32>
    %c0_13 = arith.constant 0 : index
    %c1_14 = arith.constant 1 : index
    %c0_15 = arith.constant 0 : index
    %c0_16 = arith.constant 0 : index
    %c0_17 = arith.constant 0 : index
    %10 = vector.load %arg3[%c0_13, %c1_14, %c0_15, %c0_16, %c0_17] : memref<1x4x9x1x256xf32, #tpu.memory_space<vmem>>, vector<1x1x9x1x256xf32>
    %11 = vector.shape_cast %10 : vector<1x1x9x1x256xf32> to vector<9x1x256xf32>
    %12 = vector.broadcast %11 : vector<9x1x256xf32> to vector<9x8x256xf32>
    %13 = arith.mulf %9, %12 : vector<9x8x256xf32>
    %14 = arith.addf %6, %13 : vector<9x8x256xf32>
    %c0_18 = arith.constant 0 : index
    %c2 = arith.constant 2 : index
    %c0_19 = arith.constant 0 : index
    %c0_20 = arith.constant 0 : index
    %c0_21 = arith.constant 0 : index
    %15 = vector.load %arg2[%c0_18, %c2, %c0_19, %c0_20, %c0_21] : memref<1x4x9x8x256xbf16, #tpu.memory_space<vmem>>, vector<1x1x9x8x256xbf16>
    %16 = vector.shape_cast %15 : vector<1x1x9x8x256xbf16> to vector<9x8x256xbf16>
    %17 = arith.extf %16 : vector<9x8x256xbf16> to vector<9x8x256xf32>
    %c0_22 = arith.constant 0 : index
    %c2_23 = arith.constant 2 : index
    %c0_24 = arith.constant 0 : index
    %c0_25 = arith.constant 0 : index
    %c0_26 = arith.constant 0 : index
    %18 = vector.load %arg3[%c0_22, %c2_23, %c0_24, %c0_25, %c0_26] : memref<1x4x9x1x256xf32, #tpu.memory_space<vmem>>, vector<1x1x9x1x256xf32>
    %19 = vector.shape_cast %18 : vector<1x1x9x1x256xf32> to vector<9x1x256xf32>
    %20 = vector.broadcast %19 : vector<9x1x256xf32> to vector<9x8x256xf32>
    %21 = arith.mulf %17, %20 : vector<9x8x256xf32>
    %22 = arith.addf %14, %21 : vector<9x8x256xf32>
    %c0_27 = arith.constant 0 : index
    %c3 = arith.constant 3 : index
    %c0_28 = arith.constant 0 : index
    %c0_29 = arith.constant 0 : index
    %c0_30 = arith.constant 0 : index
    %23 = vector.load %arg2[%c0_27, %c3, %c0_28, %c0_29, %c0_30] : memref<1x4x9x8x256xbf16, #tpu.memory_space<vmem>>, vector<1x1x9x8x256xbf16>
    %24 = vector.shape_cast %23 : vector<1x1x9x8x256xbf16> to vector<9x8x256xbf16>
    %25 = arith.extf %24 : vector<9x8x256xbf16> to vector<9x8x256xf32>
    %c0_31 = arith.constant 0 : index
    %c3_32 = arith.constant 3 : index
    %c0_33 = arith.constant 0 : index
    %c0_34 = arith.constant 0 : index
    %c0_35 = arith.constant 0 : index
    %26 = vector.load %arg3[%c0_31, %c3_32, %c0_33, %c0_34, %c0_35] : memref<1x4x9x1x256xf32, #tpu.memory_space<vmem>>, vector<1x1x9x1x256xf32>
    %27 = vector.shape_cast %26 : vector<1x1x9x1x256xf32> to vector<9x1x256xf32>
    %28 = vector.broadcast %27 : vector<9x1x256xf32> to vector<9x8x256xf32>
    %29 = arith.mulf %25, %28 : vector<9x8x256xf32>
    %30 = arith.addf %22, %29 : vector<9x8x256xf32>
    %31 = vector.shape_cast %30 : vector<9x8x256xf32> to vector<72x256xf32>
    %32 = arith.truncf %31 : vector<72x256xf32> to vector<72x256xbf16>
    %c0_36 = arith.constant 0 : index
    %c0_37 = arith.constant 0 : index
    %33 = vector.load %arg4[%c0_36, %c0_37] : memref<8x72xbf16, #tpu.memory_space<vmem>>, vector<8x72xbf16>
    %cst = arith.constant dense<0.000000e+00> : vector<8x256xf32>
    %34 = tpu.matmul %33, %32, %cst {dimension_numbers = #tpu.dot_dimension_numbers<[1], [0], [0], [1], [0, 0, 1, 1], [], []>} : vector<8x72xbf16>, vector<72x256xbf16>, vector<8x256xf32> -> vector<8x256xf32>
    %c0_38 = arith.constant 0 : index
    %c0_39 = arith.constant 0 : index
    %c0_40 = arith.constant 0 : index
    %35 = vector.load %arg5[%c0_38, %c0_39, %c0_40] : memref<1x8x256xf32, #tpu.memory_space<vmem>>, vector<1x8x256xf32>
    %36 = vector.shape_cast %35 : vector<1x8x256xf32> to vector<8x256xf32>
    %37 = vector.shape_cast %34 : vector<8x256xf32> to vector<1x8x256xf32>
    tpu.vector_store %arg5[%c0_38, %c0_39, %c0_40], %37 {strides = array<i32>} : memref<1x8x256xf32, #tpu.memory_space<vmem>>, vector<1x8x256xf32>,
    return
  }
  func.func @transform_0(%arg0: i32, %arg1: i32) -> (i32, i32, i32, i32, i32) {
    %c0_i32 = arith.constant 0 : i32
    %c0_i32_0 = arith.constant 0 : i32
    %c0_i32_1 = arith.constant 0 : i32
    %c0_i32_2 = arith.constant 0 : i32
    return %arg0, %c0_i32, %c0_i32_0, %c0_i32_1, %arg1 : i32, i32, i32, i32, i32
  }
  func.func @transform_1(%arg0: i32, %arg1: i32) -> (i32, i32, i32, i32, i32) {
    %c0_i32 = arith.constant 0 : i32
    %c0_i32_0 = arith.constant 0 : i32
    %c0_i32_1 = arith.constant 0 : i32
    %c0_i32_2 = arith.constant 0 : i32
    return %arg0, %c0_i32, %c0_i32_0, %c0_i32_1, %arg1 : i32, i32, i32, i32, i32
  }
  func.func @transform_2(%arg0: i32, %arg1: i32) -> (i32, i32) {
    %c0_i32 = arith.constant 0 : i32
    %c0_i32_0 = arith.constant 0 : i32
    %c0_i32_1 = arith.constant 0 : i32
    return %c0_i32, %c0_i32_0 : i32, i32
  }
  func.func @transform_3(%arg0: i32, %arg1: i32) -> (i32, i32, i32) {
    %c0_i32 = arith.constant 0 : i32
    %c0_i32_0 = arith.constant 0 : i32
    return %arg0, %c0_i32, %arg1 : i32, i32, i32
  }
}

</mosaic_0001>

<bundles_post_ra>
// kernel: defc_forward.2
= control target key start
LH: loop header
LB: loop body
LE: loop exit
PB: predicated region body
PF: predicated region fallthrough
CT: control target
= control target key end

     0   :  { %s647_s9 = smov 0   ;;  %s649_s10 = smov 0   ;;  %s751_s0 = inlined_call_operand.vmem [shape: f32[2,8,512], index: 0, kind: input, shape index: {}]   ;;  %s752_s1 = inlined_call_operand.vmem [shape: bf16[18,72], index: 1, kind: input, shape index: {}]   ;;  %s753_s2 = inlined_call_operand.vmem [shape: f32[2,18,384], index: 2, kind: output, shape index: {}]  }
   0x1   :  { %s651_s11 = smov 0  }
   0x2 LB: > { %s24_s12 = sadd.s32 1, %s618_s10  ;;  %p494_p0 = scmp.ge.s32.totalorder %s622_s11, 1  ;;  %s622_s11 = sphi %s651_s11, %s12_s11   ;;  %s618_s10 = sphi %s649_s10, %s755_s10   ;;  %s614_s9 = sphi %s647_s9, %s754_s9  }
   0x3   : > { %p26_p1 = scmp.ge.s32.totalorder %s24_s12, 2  ;;  %p126_p2 = scmp.lt.s32.totalorder %s622_s11, 3 }
   0x5   : > { %s757_s12 = smov (%p26_p1, %s24_s12), 0  ;;  %p127_p3 = pnand %p494_p0, %p126_p2 }
   0x6   : > { %p152_p4 = scmp.lt.s32.totalorder (!%p127_p3), %s614_s9, 1  ;;  %s624_s17 = smov (!%p127_p3), 91  }
   0x7   : > { %130 = sbr.rel (%p127_p3) target bundleno = 335 (0x14f), region = 28  ;;  %s625_s18 = smov (!%p127_p3), 90  }
   0x8   : > { %s626_s19 = smov (!%p127_p3), 109   ;;  %s627_s20 = smov (!%p127_p3), 92  }
   0x9   : > { %s628_s21 = smov (!%p127_p3), 108   ;;  %s629_s22 = smov (!%p127_p3), 126  }
   0xa   : > { %s630_s23 = smov (!%p127_p3), 110   ;;  %s631_s24 = smov (!%p127_p3), 127  }
   0xc   : > { %s759_s9 = smov (!%p152_p4, %s614_s9), 1  ;;  %vm294_vm0 = vcmask 736256   ;;  %vm334_vm1 = vcmask 1043456   ;;  %vm264_vm2 = vcmask 752640   ;;  %vm279_vm3 = vcmask 744448  }
   0xd   : > { %s510_s13 = sshll.u32 %s759_s9, 5  ;;  %vm249_vm4 = vcmask 883712   ;;  %vm234_vm5 = vcmask 891904   ;;  %vm204_vm6 = vcmask 1031168   ;;  %vm219_vm7 = vcmask 900096   ;;  %s517_s29 = smul.u32 72, %s759_s9 }
   0xe   : > { %s156_s16 = scalar_lea.vmem %s751_s0, %s510_s13  ;;  %vm189_vm8 = vcmask 1039360   ;;  %vm327_vm9 = vcmask 588800  }
   0xf   : > { %v671_v0 = vld [vmem:[%s156_s16 + $0x10] sm:$0xff]  ;;  %v176_v1 = vld [vmem:[%s156_s16 + $0x18] sm:$0xff]  ;;  %v674_v3 = vld [vmem:[%s156_s16] sm:$0xff]  ;;  %s165_s4 = scalar_lea.vmem %s753_s2, %s517_s29 }
  0x10   : > { %v560_v2 = vpack.i.bf16 %v176_v1, %v671_v0  ;;  %v676_v4 = vld [vmem:[%s156_s16 + $0x8] sm:$0xff] }
  0x11   : > { %v565_v5 = vpack.i.bf16 %v674_v3, %v676_v4 }
  0x12   : > { %561 = vrot.lane.b32.xlu1 %v560_v2, %s624_s17  ;;  %551 = vrot.lane.b32.xlu0 %v560_v2, %s625_s18 }
  0x13   : > { %571 = vrot.lane.b32.xlu2 %v560_v2, %s626_s19 }
  0x1a   : > { %556 = vrot.lane.b32.xlu0 %v560_v2, %s627_s20  ;;  %566 = vrot.lane.b32.xlu1 %v565_v5, %s625_s18 }
  0x1b   : > { %576 = vrot.lane.b32.xlu2 %v560_v2, %s628_s21 }
  0x22   : > { %581 = vrot.lane.b32.xlu0 %v565_v5, %s627_s20  ;;  %273 = vrot.lane.b32.xlu1 %v676_v4, %s624_s17 }
  0x23   : > { %586 = vrot.lane.b32.xlu2 %v560_v2, %s629_s22 }
  0x2a   : > { %591 = vrot.lane.b32.xlu0 %v560_v2, %s630_s23  ;;  %228 = vrot.lane.b32.xlu1 %v676_v4, %s626_s19 }
  0x2b   : > { %243 = vrot.lane.b32.xlu2 %v676_v4, %s628_s21 }
  0x32   : > { %596 = vrot.lane.b32.xlu0 %v560_v2, %s631_s24  ;;  %198 = vrot.lane.b32.xlu1 %v676_v4, %s629_s22 }
  0x33   : > { %213 = vrot.lane.b32.xlu2 %v676_v4, %s630_s23 }
  0x3a   : > { %271 = vrot.lane.b32.xlu0 %v674_v3, %s624_s17  ;;  %183 = vrot.lane.b32.xlu1 %v676_v4, %s631_s24 }
  0x3b   : > { %226 = vrot.lane.b32.xlu2 %v674_v3, %s626_s19 }
  0x42   : > { %241 = vrot.lane.b32.xlu0 %v674_v3, %s628_s21  ;;  %196 = vrot.lane.b32.xlu1 %v674_v3, %s629_s22 }
  0x43   : > { %211 = vrot.lane.b32.xlu2 %v674_v3, %s630_s23 }
  0x4a   : > { %181 = vrot.lane.b32.xlu0 %v674_v3, %s631_s24 }
  0x6d   : > { %v692_v6 = vpop.permute.xlu2 %571 }
  0x6e   : > { %v574_v17 = vunpack.i.h.bf16 %v692_v6  ;;  %v573_v18 = vunpack.i.l.bf16 %v692_v6 }
  0x70   : > { %v237_v35 = vsel %vm234_vm5, %v573_v18, %v574_v17  ;;  %v303_v17 = vld [vmem:[%s752_s1 + $0x8] sm:$0x1] }
  0x75   : > { %v577_v7 = vpop.permute.xlu2 %576 }
  0x76   : > { %v579_v19 = vunpack.i.h.bf16 %v577_v7  ;;  %v578_v20 = vunpack.i.l.bf16 %v577_v7 }
  0x78   : > { %v252_v36 = vsel %vm249_vm4, %v578_v20, %v579_v19 }
  0x79   : > { %v312_v41 = vpack.c.bf16 %v252_v36, %v237_v35 }
  0x7d   : > { %v587_v23 = vpop.permute.xlu2 %586 }
  0x7e   : > { %v589_v47 = vunpack.i.h.bf16 %v587_v23  ;;  %v588_v48 = vunpack.i.l.bf16 %v587_v23 }
  0x80   : > { %v207_v56 = vsel %vm204_vm6, %v588_v48, %v589_v47 }
  0x84   : > { %v562_v8 = vpop.permute.xlu1 %561  ;;  %v552_v9 = vpop.permute.xlu0 %551 }
  0x85   : > { %v554_v10 = vunpack.i.h.bf16 %v552_v9  ;;  %v553_v11 = vunpack.i.l.bf16 %v552_v9  ;;  %v564_v15 = vunpack.i.h.bf16 %v562_v8  ;;  %v563_v16 = vunpack.i.l.bf16 %v562_v8  ;;  %v244_v43 = vpop.permute.xlu2 %243  ;;  %v511_v9 = vld [vmem:[%s752_s1] sm:$0xff] }
  0x86   : > { %v251_v51 = vsel %vm249_vm4, %v244_v43, %v578_v20 }
  0x87   : > { %v297_v12 = vsel %vm294_vm0, %v553_v11, %v554_v10  ;;  %v282_v29 = vsel %vm279_vm3, %v563_v16, %v564_v15 }
  0x88   : > { %v318_v13 = vpack.c.bf16 %v297_v12, %v297_v12 }
  0x8a   : > { %v342_v14 = vsel %vm334_vm1, %v318_v13, 0 }
  0x8b   : > { %383 = vmatpush.bf16.msra.mxu2 %v342_v14 }
  0x8c   : > { %v557_v21 = vpop.permute.xlu0 %556  ;;  %v567_v22 = vpop.permute.xlu1 %566 }
  0x8d   : > { %v559_v24 = vunpack.i.h.bf16 %v557_v21  ;;  %v558_v25 = vunpack.i.l.bf16 %v557_v21  ;;  %v569_v26 = vunpack.i.h.bf16 %v567_v22  ;;  %v568_v27 = vunpack.i.l.bf16 %v567_v22  ;;  %v214_v59 = vpop.permute.xlu2 %213 }
  0x8e   : > { %v324_v22 = vunpack.c.l.b16 %v303_v17 }
  0x8f   : > { %v267_v28 = vsel %vm264_vm2, %v558_v25, %v559_v24  ;;  %v296_v30 = vsel %vm294_vm0, %v568_v27, %v553_v11  ;;  %v295_v31 = vsel %vm294_vm0, %v569_v26, %v568_v27 }
  0x90   : > { %v315_v32 = vpack.c.bf16 %v282_v29, %v267_v28  ;;  %v317_v33 = vpack.c.bf16 %v296_v30, %v296_v30  ;;  %v316_v34 = vpack.c.bf16 %v295_v31, %v295_v31  ;;  %v326_v26 = vpack.c.b16 %v324_v22, %v324_v22 }
  0x92   : > { %384 = vmatpush.bf16.msra.mxu2 %v315_v32  ;;  %v339_v37 = vsel %vm334_vm1, %v317_v33, 0  ;;  %v336_v38 = vsel %vm334_vm1, %v316_v34, 0 }
  0x93   : > { %365 = vmatpush.bf16.msra.mxu1 %v339_v37  ;;  %347 = vmatpush.bf16.msra.mxu0 %v336_v38 }
  0x94   : > { %v582_v39 = vpop.permute.xlu0 %581  ;;  %v274_v40 = vpop.permute.xlu1 %273  ;;  %512 = vmatpush.bf16.msra.mxu3 %v336_v38 }
  0x95   : > { %v583_v42 = vunpack.i.l.bf16 %v582_v39  ;;  %v281_v44 = vsel %vm279_vm3, %v274_v40, %v563_v16  ;;  %v584_v8 = vunpack.i.h.bf16 %v582_v39  ;;  %v227_v10 = vpop.permute.xlu2 %226 }
  0x96   : > { %385 = vmatpush.bf16.msra.mxu2 %v312_v41 }
  0x97   : > { %v266_v45 = vsel %vm264_vm2, %v583_v42, %v558_v25  ;;  %v265_v15 = vsel %vm264_vm2, %v584_v8, %v583_v42 }
  0x98   : > { %v314_v46 = vpack.c.bf16 %v281_v44, %v266_v45 }
  0x9a   : > { %366 = vmatpush.bf16.msra.mxu1 %v314_v46 }
  0x9c   : > { %v592_v49 = vpop.permute.xlu0 %591  ;;  %v229_v50 = vpop.permute.xlu1 %228 }
  0x9d   : > { %v594_v52 = vunpack.i.h.bf16 %v592_v49  ;;  %v593_v53 = vunpack.i.l.bf16 %v592_v49  ;;  %v236_v54 = vsel %vm234_vm5, %v229_v50, %v573_v18  ;;  %v235_v20 = vsel %vm234_vm5, %v227_v10, %v229_v50  ;;  %v212_v23 = vpop.permute.xlu2 %211 }
  0x9e   : > { %v311_v55 = vpack.c.bf16 %v251_v51, %v236_v54  ;;  %v220_v25 = vsel %vm219_vm7, %v212_v23, %v214_v59 }
  0x9f   : > { %v222_v57 = vsel %vm219_vm7, %v593_v53, %v594_v52  ;;  %v221_v2 = vsel %vm219_vm7, %v214_v59, %v593_v53 }
  0xa0   : > { %367 = vmatpush.bf16.msra.mxu1 %v311_v55  ;;  %v309_v58 = vpack.c.bf16 %v222_v57, %v207_v56 }
  0xa2   : > { %386 = vmatpush.bf16.msra.mxu2 %v309_v58 }
  0xa4   : > { %v597_v60 = vpop.permute.xlu0 %596  ;;  %v199_v61 = vpop.permute.xlu1 %198 }
  0xa5   : > { %v599_v62 = vunpack.i.h.bf16 %v597_v60  ;;  %v598_v63 = vunpack.i.l.bf16 %v597_v60  ;;  %v206_v1 = vsel %vm204_vm6, %v199_v61, %v588_v48 }
  0xa6   : > { %v308_v5 = vpack.c.bf16 %v221_v2, %v206_v1 }
  0xa7   : > { %v192_v6 = vsel %vm189_vm8, %v598_v63, %v599_v62 }
  0xa8   : > { %368 = vmatpush.bf16.msra.mxu1 %v308_v5  ;;  %v306_v7 = vpack.c.bf16 %v192_v6, %v671_v0 }
  0xaa   : > { %387 = vmatpush.bf16.msra.mxu2 %v306_v7 }
  0xac   : > { %v272_v11 = vpop.permute.xlu0 %271  ;;  %v184_v12 = vpop.permute.xlu1 %183 }
  0xad   : > { %v280_v13 = vsel %vm279_vm3, %v272_v11, %v274_v40  ;;  %v191_v14 = vsel %vm189_vm8, %v184_v12, %v598_v63  ;;  %506 = vmatmul.msk.bf16.vlgmr.msra.gmra.mxu2 %vm327_vm9, %v511_v9 }
  0xae   : > { %v313_v16 = vpack.c.bf16 %v280_v13, %v265_v15  ;;  %v305_v0 = vpack.c.bf16 %v191_v14, %v676_v4 }
  0xb0   : > { %348 = vmatpush.bf16.msra.mxu0 %v313_v16  ;;  %513 = vmatpush.bf16.msra.mxu3 %v313_v16 }
  0xb1   : > { %369 = vmatpush.bf16.msra.mxu1 %v305_v0 }
  0xb4   : > { %504 = vmatmul.msk.bf16.vlgmr.msra.gmra.mxu1 %vm327_vm9, %v511_v9  ;;  %v242_v18 = vpop.permute.xlu0 %241  ;;  %v197_v19 = vpop.permute.xlu1 %196 }
  0xb5   : > { %v250_v21 = vsel %vm249_vm4, %v242_v18, %v244_v43  ;;  %v205_v4 = vsel %vm204_vm6, %v197_v19, %v199_v61 }
  0xb6   : > { %v310_v24 = vpack.c.bf16 %v250_v21, %v235_v20  ;;  %v307_v27 = vpack.c.bf16 %v220_v25, %v205_v4 }
  0xb8   : > { %349 = vmatpush.bf16.msra.mxu0 %v310_v24  ;;  %514 = vmatpush.bf16.msra.mxu3 %v310_v24 }
  0xbc   : > { %v182_v28 = vpop.permute.xlu0 %181  ;;  %350 = vmatpush.bf16.msra.mxu0 %v307_v27  ;;  %515 = vmatpush.bf16.msra.mxu3 %v307_v27 }
  0xbd   : > { %v190_v29 = vsel %vm189_vm8, %v182_v28, %v184_v12  ;;  %507 = vmatmul.msk.bf16.gmra.mxu2 %vm327_vm9, %v326_v26 }
  0xbe   : > { %v304_v30 = vpack.c.bf16 %v190_v29, %v674_v3 }
  0xc0   : > { %351 = vmatpush.bf16.msra.mxu0 %v304_v30  ;;  %516 = vmatpush.bf16.msra.mxu3 %v304_v30 }
  0xc3   : > { %502 = vmatmul.msk.bf16.vlgmr.msra.gmra.mxu0 %vm327_vm9, %v511_v9  ;;  %503 = vmatmul.msk.bf16.vlgmr.msra.gmra.mxu3 %vm327_vm9, %v326_v26 }
  0xc4   : > { %505 = vmatmul.msk.bf16.gmra.mxu1 %vm327_vm9, %v326_v26 }
 0x130   : > { %v389_v31 = vpop.f32.mrf.mxu2 }
 0x131   : > { %v371_v32 = vpop.f32.mrf.mxu1  ;;  %400 = vst [vmem:[%s165_s4 + $0x10] sm:$0xff] %v389_v31 }
 0x132   : > { %399 = vst [vmem:[%s165_s4 + $0x8] sm:$0xff] %v371_v32 }
 0x138   : > { %v391_v33 = vpop.f32.mrf.mxu2 }
 0x139   : > { %v373_v34 = vpop.f32.mrf.mxu1  ;;  %403 = vst [vmem:[%s165_s4 + $0x28] sm:$0xff] %v391_v33 }
 0x13a   : > { %402 = vst [vmem:[%s165_s4 + $0x20] sm:$0xff] %v373_v34 }
 0x140   : > { %v353_v3 = vpop.f32.mrf.mxu0  ;;  %v394_v35 = vpop.f32.mrf.mxu2 }
 0x141   : > { %398 = vst [vmem:[%s165_s4] sm:$0xff] %v353_v3  ;;  %v376_v36 = vpop.f32.mrf.mxu1 }
 0x142   : > { %405 = vst [vmem:[%s165_s4 + $0x38] sm:$0x3] %v376_v36 }
 0x143   : > { %406 = vst [vmem:[%s165_s4 + $0x40] sm:$0x3] %v394_v35 }
 0x146   : > { %v358_v37 = vpop.f32.mrf.mxu3 }
 0x147   : > { %404 = vst [vmem:[%s165_s4 + $0x30] sm:$0x3] %v358_v37 }
 0x148   : > { %v355_v38 = vpop.f32.mrf.mxu0  ;;  %v396_v39 = vpop.f32.mrf.mxu2 }
 0x149   : > { %401 = vst [vmem:[%s165_s4 + $0x18] sm:$0xff] %v355_v38  ;;  %v378_v40 = vpop.f32.mrf.mxu1 }
 0x14e   : > { %v360_v41 = vpop.f32.mrf.mxu3 }
 0x14f PF: > { %s12_s11 = sadd.s32 1, %s622_s11   ;;  %s754_s9 = smov %s618_s10 }
 0x150   : > { %p9_p5 = scmp.ge.s32.totalorder %s12_s11, 4   ;;  %s755_s10 = smov %s757_s12 }
 0x152   :  { %11 = sbr.rel (!%p9_p5) target bundleno = 2 (0x2), region = 59 }

// kernel: defc_forward.3
= control target key start
LH: loop header
LB: loop body
LE: loop exit
PB: predicated region body
PF: predicated region fallthrough
CT: control target
= control target key end

     0   :  { %s989_s12 = smov 0   ;;  %s991_s13 = smov 0   ;;  %s1259_s0 = inlined_call_operand.vmem [shape: bf16[2,4,9,8,256], index: 0, kind: input, shape index: {}]   ;;  %s1260_s1 = inlined_call_operand.vmem [shape: f32[2,4,9,1,256], index: 1, kind: input, shape index: {}]   ;;  %s1261_s2 = inlined_call_operand.vmem [shape: bf16[8,72], index: 2, kind: input, shape index: {}]   ;;  %s1262_s3 = inlined_call_operand.vmem [shape: f32[2,8,256], index: 3, kind: output, shape index: {}]  }
   0x1   :  { %s993_s14 = smov 0  }
   0x2 LB: > { %s25_s15 = sadd.s32 1, %s963_s13  ;;  %p856_p0 = scmp.ge.s32.totalorder %s967_s14, 1  ;;  %s967_s14 = sphi %s993_s14, %s13_s14   ;;  %s963_s13 = sphi %s991_s13, %s1264_s13   ;;  %s959_s12 = sphi %s989_s12, %s1263_s12  }
   0x3   : > { %p27_p1 = scmp.ge.s32.totalorder %s25_s15, 2  ;;  %p174_p2 = scmp.lt.s32.totalorder %s967_s14, 3 }
   0x5   : > { %s1266_s15 = smov (%p27_p1, %s25_s15), 0  ;;  %p175_p3 = pnand %p856_p0, %p174_p2 }
   0x6   : > { %p215_p4 = scmp.lt.s32.totalorder (!%p175_p3), %s959_s12, 1 }
   0x7   : > { %178 = sbr.rel (%p175_p3) target bundleno = 230 (0xe6), region = 32 }
   0xc   : > { %s1268_s12 = smov (!%p215_p4, %s959_s12), 1  ;;  %vm715_vm0 = vcmask 1043456   ;;  %vm711_vm1 = vcmask 588800  }
   0xd   : > { %s919_s16 = smul.u32 288, %s1268_s12  ;;  %s918_s26 = sshll.u32 %s1268_s12, 4 }
   0xe   : > { %s920_s17 = smul.u32 72, %s1268_s12  ;;  %s241_s29 = scalar_lea.vmem %s1262_s3, %s918_s26 }
   0xf   : > { %s1014_s20 = scalar_lea.vmem %s1259_s0, %s919_s16 }
  0x10   : > { %s1019_s23 = scalar_lea.vmem %s1260_s1, %s920_s17  ;;  %v252_v0 = vld [vmem:[%s1014_s20 + $0x40] sm:$0xff]  ;;  %v868_v1 = vld [vmem:[%s1014_s20 + $0x88] sm:$0xff]  ;;  %v886_v2 = vld [vmem:[%s1014_s20 + $0xd0] sm:$0xff] }
  0x11   : > { %v269_v3 = vunpack.c.l.bf16 %v252_v0  ;;  %v279_v4 = vld [vmem:[%s1019_s23 + $0x10] sm:$0x3]  ;;  %v369_v5 = vunpack.c.l.bf16 %v868_v1  ;;  %v877_v6 = vld [vmem:[%s1019_s23 + $0x22] sm:$0x3]  ;;  %v488_v7 = vunpack.c.l.bf16 %v886_v2  ;;  %v895_v8 = vld [vmem:[%s1019_s23 + $0x34] sm:$0x3]  ;;  %v270_v9 = vunpack.c.h.bf16 %v252_v0 }
  0x12   : > { %v305_v10 = vperm.slane %v279_v4, 0  ;;  %v406_v11 = vperm.slane %v877_v6, 0  ;;  %v525_v12 = vperm.slane %v895_v8, 0  ;;  %v904_v13 = vld [vmem:[%s1014_s20 + $0x118] sm:$0xff]  ;;  %v913_v14 = vld [vmem:[%s1019_s23 + $0x46] sm:$0x3]  ;;  %v370_v15 = vunpack.c.h.bf16 %v868_v1 }
  0x13   : > { %v607_v16 = vunpack.c.l.bf16 %v904_v13  ;;  %v644_v17 = vperm.slane %v913_v14, 0  ;;  %v306_v18 = vperm.slane %v279_v4, 1  ;;  %v407_v19 = vperm.slane %v877_v6, 1  ;;  %v1030_v20 = vld [vmem:[%s1014_s20 + $0x30] sm:$0xff]  ;;  %v1033_v25 = vld [vmem:[%s1014_s20 + $0x38] sm:$0xff]  ;;  %v1046_v37 = vld [vmem:[%s1014_s20 + $0x80] sm:$0xff] }
  0x14   : > { %v341_v21 = vmul.f32 %v305_v10, %v269_v3  ;;  %v442_v22 = vmul.f32 %v406_v11, %v369_v5  ;;  %v561_v23 = vmul.f32 %v525_v12, %v488_v7  ;;  %v489_v24 = vunpack.c.h.bf16 %v886_v2  ;;  %v1036_v26 = vld [vmem:[%s1019_s23 + $0xc] sm:$0x3]  ;;  %v1039_v31 = vld [vmem:[%s1019_s23 + $0xe] sm:$0x3]  ;;  %v1042_v32 = vld [vmem:[%s1014_s20 + $0x78] sm:$0xff] }
  0x15   : > { %v680_v27 = vmul.f32 %v644_v17, %v607_v16  ;;  %v342_v28 = vmul.f32 %v306_v18, %v270_v9  ;;  %v443_v29 = vmul.f32 %v407_v19, %v370_v15  ;;  %v526_v30 = vperm.slane %v895_v8, 1  ;;  %v1049_v38 = vld [vmem:[%s1019_s23 + $0x1e] sm:$0x3]  ;;  %v876_v43 = vld [vmem:[%s1019_s23 + $0x20] sm:$0x3]  ;;  %v1060_v49 = vld [vmem:[%s1014_s20 + $0xc8] sm:$0xff] }
  0x16   : > { %v460_v33 = vadd.f32 %v442_v22, %v341_v21  ;;  %v608_v34 = vunpack.c.h.bf16 %v904_v13  ;;  %v645_v35 = vperm.slane %v913_v14, 1  ;;  %v265_v36 = vunpack.c.l.bf16 %v1030_v20  ;;  %v1055_v44 = vld [vmem:[%s1014_s20 + $0xc0] sm:$0xff]  ;;  %v1063_v50 = vld [vmem:[%s1019_s23 + $0x30] sm:$0x3]  ;;  %v1068_v55 = vld [vmem:[%s1019_s23 + $0x32] sm:$0x3] }
  0x17   : > { %v461_v39 = vadd.f32 %v443_v29, %v342_v28  ;;  %v562_v40 = vmul.f32 %v526_v30, %v489_v24  ;;  %v267_v41 = vunpack.c.l.bf16 %v1033_v25  ;;  %v301_v42 = vperm.slane %v1036_v26, 0  ;;  %v1071_v56 = vld [vmem:[%s1014_s20 + $0x108] sm:$0xff]  ;;  %v1075_v61 = vld [vmem:[%s1014_s20 + $0x110] sm:$0xff]  ;;  %v911_v2 = vld [vmem:[%s1019_s23 + $0x42] sm:$0x3] }
  0x18   : > { %v579_v45 = vadd.f32 %v561_v23, %v460_v33  ;;  %v681_v46 = vmul.f32 %v645_v35, %v608_v34  ;;  %v303_v47 = vperm.slane %v1039_v31, 0  ;;  %v365_v48 = vunpack.c.l.bf16 %v1042_v32  ;;  %v1083_v7 = vld [vmem:[%s1019_s23 + $0x44] sm:$0x3] }
  0x19   : > { %v580_v51 = vadd.f32 %v562_v40, %v461_v39  ;;  %v337_v52 = vmul.f32 %v301_v42, %v265_v36  ;;  %v367_v53 = vunpack.c.l.bf16 %v1046_v37  ;;  %v402_v54 = vperm.slane %v1049_v38, 0 }
  0x1a   : > { %v698_v57 = vadd.f32 %v680_v27, %v579_v45  ;;  %v339_v58 = vmul.f32 %v303_v47, %v267_v41  ;;  %v404_v59 = vperm.slane %v876_v43, 0  ;;  %v484_v60 = vunpack.c.l.bf16 %v1055_v44  ;;  %v1101_v41 = vld [vmem:[%s1014_s20 + $0x20] sm:$0xff]  ;;  %v1110_v47 = vld [vmem:[%s1019_s23 + $0xa] sm:$0x3] }
  0x1b   : > { %v699_v62 = vadd.f32 %v681_v46, %v580_v51  ;;  %v438_v63 = vmul.f32 %v402_v54, %v365_v48  ;;  %v486_v0 = vunpack.c.l.bf16 %v1060_v49  ;;  %v521_v1 = vperm.slane %v1063_v50, 0  ;;  %v275_v46 = vld [vmem:[%s1019_s23 + $0x8] sm:$0x3]  ;;  %v873_v54 = vld [vmem:[%s1019_s23 + $0x1a] sm:$0x3] }
  0x1c   : > { %v708_v3 = vpack.c.bf16 %v698_v57, %v698_v57  ;;  %v440_v4 = vmul.f32 %v404_v59, %v367_v53  ;;  %v523_v5 = vperm.slane %v1068_v55, 0  ;;  %v603_v6 = vunpack.c.l.bf16 %v1071_v56  ;;  %v1116_v53 = vld [vmem:[%s1014_s20 + $0x70] sm:$0xff]  ;;  %v874_v59 = vld [vmem:[%s1019_s23 + $0x1c] sm:$0x3] }
  0x1d   : > { %v709_v8 = vpack.c.bf16 %v699_v62, %v699_v62  ;;  %v456_v9 = vadd.f32 %v438_v63, %v337_v52  ;;  %v557_v10 = vmul.f32 %v521_v1, %v484_v60  ;;  %v605_v11 = vunpack.c.l.bf16 %v1075_v61  ;;  %v1113_v52 = vld [vmem:[%s1014_s20 + $0x68] sm:$0xff]  ;;  %v1126_v1 = vld [vmem:[%s1014_s20 + $0xb8] sm:$0xff] }
  0x1e   : > { %v717_v12 = vsel %vm715_vm0, %v708_v3, 0  ;;  %v458_v13 = vadd.f32 %v440_v4, %v339_v58  ;;  %v559_v14 = vmul.f32 %v523_v5, %v486_v0  ;;  %v640_v15 = vperm.slane %v911_v2, 0  ;;  %v882_v0 = vld [vmem:[%s1014_s20 + $0xb0] sm:$0xff] }
  0x1f   : > { %725 = vmatpush.bf16.msra.mxu0 %v717_v12  ;;  %v720_v16 = vsel %vm715_vm0, %v709_v8, 0  ;;  %v575_v17 = vadd.f32 %v557_v10, %v456_v9  ;;  %v642_v18 = vperm.slane %v1083_v7, 0  ;;  %v266_v19 = vunpack.c.h.bf16 %v1030_v20  ;;  %v1133_v8 = vld [vmem:[%s1014_s20 + $0xf8] sm:$0xff] }
  0x20   : > { %738 = vmatpush.bf16.msra.mxu1 %v720_v16  ;;  %v577_v21 = vadd.f32 %v559_v14, %v458_v13  ;;  %v676_v22 = vmul.f32 %v640_v15, %v603_v6  ;;  %v268_v23 = vunpack.c.h.bf16 %v1033_v25  ;;  %v302_v24 = vperm.slane %v1036_v26, 1  ;;  %v891_v6 = vld [vmem:[%s1019_s23 + $0x2c] sm:$0x3]  ;;  %v1136_v13 = vld [vmem:[%s1014_s20 + $0x100] sm:$0xff]  ;;  %v909_v14 = vld [vmem:[%s1019_s23 + $0x3e] sm:$0x3] }
  0x21   : > { %v678_v27 = vmul.f32 %v642_v18, %v605_v11  ;;  %v304_v28 = vperm.slane %v1039_v31, 1  ;;  %v366_v29 = vunpack.c.h.bf16 %v1042_v32  ;;  %v368_v30 = vunpack.c.h.bf16 %v1046_v37 }
  0x22   : > { %v694_v33 = vadd.f32 %v676_v22, %v575_v17  ;;  %v338_v34 = vmul.f32 %v302_v24, %v266_v19  ;;  %v403_v20 = vperm.slane %v1049_v38, 1  ;;  %v405_v35 = vperm.slane %v876_v43, 1  ;;  %v1104_v38 = vld [vmem:[%s1014_s20 + $0x28] sm:$0xff]  ;;  %v910_v19 = vld [vmem:[%s1019_s23 + $0x40] sm:$0x3] }
  0x23   : > { %v696_v36 = vadd.f32 %v678_v27, %v577_v21  ;;  %v340_v25 = vmul.f32 %v304_v28, %v268_v23  ;;  %v485_v26 = vunpack.c.h.bf16 %v1055_v44  ;;  %v487_v39 = vunpack.c.h.bf16 %v1060_v49 }
  0x24   : > { %v439_v40 = vmul.f32 %v403_v20, %v366_v29  ;;  %v441_v31 = vmul.f32 %v405_v35, %v368_v30  ;;  %v522_v32 = vperm.slane %v1063_v50, 1  ;;  %v524_v37 = vperm.slane %v1068_v55, 1 }
  0x25   : > { %v706_v42 = vpack.c.bf16 %v696_v36, %v694_v33  ;;  %v604_v43 = vunpack.c.h.bf16 %v1071_v56  ;;  %v606_v44 = vunpack.c.h.bf16 %v1075_v61  ;;  %v641_v45 = vperm.slane %v911_v2, 1 }
  0x26   : > { %v457_v48 = vadd.f32 %v439_v40, %v338_v34  ;;  %v459_v49 = vadd.f32 %v441_v31, %v340_v25  ;;  %v558_v50 = vmul.f32 %v522_v32, %v485_v26  ;;  %v560_v51 = vmul.f32 %v524_v37, %v487_v39 }
  0x27   : > { %726 = vmatpush.bf16.msra.mxu0 %v706_v42  ;;  %v643_v55 = vperm.slane %v1083_v7, 1  ;;  %v677_v56 = vmul.f32 %v641_v45, %v604_v43  ;;  %v261_v57 = vunpack.c.l.bf16 %v1101_v41  ;;  %v263_v58 = vunpack.c.l.bf16 %v1104_v38  ;;  %v892_v7 = vld [vmem:[%s1019_s23 + $0x2e] sm:$0x3] }
  0x28   : > { %v576_v60 = vadd.f32 %v558_v50, %v457_v48  ;;  %v578_v61 = vadd.f32 %v560_v51, %v459_v49  ;;  %v297_v62 = vperm.slane %v275_v46, 0  ;;  %v299_v63 = vperm.slane %v1110_v47, 0 }
  0x29   : > { %v679_v2 = vmul.f32 %v643_v55, %v606_v44  ;;  %v361_v3 = vunpack.c.l.bf16 %v1113_v52  ;;  %v363_v4 = vunpack.c.l.bf16 %v1116_v53  ;;  %v398_v5 = vperm.slane %v873_v54, 0 }
  0x2a   : > { %v695_v9 = vadd.f32 %v677_v56, %v576_v60  ;;  %v333_v10 = vmul.f32 %v297_v62, %v261_v57  ;;  %v335_v11 = vmul.f32 %v299_v63, %v263_v58  ;;  %v400_v12 = vperm.slane %v874_v59, 0  ;;  %v1157_v58 = vld [vmem:[%s1019_s23 + $0x4] sm:$0x3]  ;;  %v274_v63 = vld [vmem:[%s1019_s23 + $0x6] sm:$0x3] }
  0x2b   : > { %v697_v15 = vadd.f32 %v679_v2, %v578_v61  ;;  %v434_v16 = vmul.f32 %v398_v5, %v361_v3  ;;  %v480_v17 = vunpack.c.l.bf16 %v882_v0  ;;  %v482_v18 = vunpack.c.l.bf16 %v1126_v1  ;;  %v1166_v5 = vld [vmem:[%s1014_s20 + $0x60] sm:$0xff] }
  0x2c   : > { %v436_v21 = vmul.f32 %v400_v12, %v363_v4  ;;  %v517_v22 = vperm.slane %v891_v6, 0  ;;  %v519_v23 = vperm.slane %v892_v7, 0  ;;  %v599_v24 = vunpack.c.l.bf16 %v1133_v8  ;;  %v1173_v12 = vld [vmem:[%s1014_s20 + $0xa0] sm:$0xff] }
  0x2d   : > { %v707_v27 = vpack.c.bf16 %v697_v15, %v695_v9  ;;  %v452_v28 = vadd.f32 %v434_v16, %v333_v10  ;;  %v601_v29 = vunpack.c.l.bf16 %v1136_v13  ;;  %v636_v30 = vperm.slane %v909_v14, 0 }
  0x2e   : > { %v454_v33 = vadd.f32 %v436_v21, %v335_v11  ;;  %v553_v34 = vmul.f32 %v517_v22, %v480_v17  ;;  %v555_v20 = vmul.f32 %v519_v23, %v482_v18  ;;  %v638_v35 = vperm.slane %v910_v19, 0  ;;  %v872_v11 = vld [vmem:[%s1019_s23 + $0x18] sm:$0x3]  ;;  %v1177_v17 = vld [vmem:[%s1014_s20 + $0xa8] sm:$0xff] }
  0x2f   : > { %739 = vmatpush.bf16.msra.mxu1 %v707_v27  ;;  %v672_v36 = vmul.f32 %v636_v30, %v599_v24  ;;  %v262_v25 = vunpack.c.h.bf16 %v1101_v41  ;;  %v264_v26 = vunpack.c.h.bf16 %v1104_v38  ;;  %v298_v39 = vperm.slane %v275_v46, 1  ;;  %v889_v18 = vld [vmem:[%s1019_s23 + $0x28] sm:$0x3] }
  0x30   : > { %v571_v40 = vadd.f32 %v553_v34, %v452_v28  ;;  %v573_v31 = vadd.f32 %v555_v20, %v454_v33  ;;  %v674_v32 = vmul.f32 %v638_v35, %v601_v29  ;;  %v300_v37 = vperm.slane %v1110_v47, 1  ;;  %v1150_v47 = vld [vmem:[%s1014_s20 + $0x10] sm:$0xff]  ;;  %v1183_v27 = vld [vmem:[%s1014_s20 + $0xe8] sm:$0xff]  ;;  %v907_v20 = vld [vmem:[%s1019_s23 + $0x3a] sm:$0x3] }
  0x31   : > { %v334_v42 = vmul.f32 %v298_v39, %v262_v25  ;;  %v362_v43 = vunpack.c.h.bf16 %v1113_v52  ;;  %v364_v44 = vunpack.c.h.bf16 %v1116_v53  ;;  %v399_v45 = vperm.slane %v873_v54, 1  ;;  %v1154_v54 = vld [vmem:[%s1014_s20 + $0x18] sm:$0xff]  ;;  %v1186_v28 = vld [vmem:[%s1014_s20 + $0xf0] sm:$0xff] }
  0x32   : > { %v690_v48 = vadd.f32 %v672_v36, %v571_v40  ;;  %v692_v49 = vadd.f32 %v674_v32, %v573_v31  ;;  %v336_v41 = vmul.f32 %v300_v37, %v264_v26  ;;  %v401_v50 = vperm.slane %v874_v59, 1  ;;  %v908_v39 = vld [vmem:[%s1019_s23 + $0x3c] sm:$0x3] }
  0x33   : > { %v435_v38 = vmul.f32 %v399_v45, %v362_v43  ;;  %v481_v46 = vunpack.c.h.bf16 %v882_v0  ;;  %v483_v51 = vunpack.c.h.bf16 %v1126_v1  ;;  %v518_v55 = vperm.slane %v891_v6, 1  ;;  %v1162_v0 = vld [vmem:[%s1014_s20 + $0x58] sm:$0xff]  ;;  %v871_v6 = vld [vmem:[%s1019_s23 + $0x16] sm:$0x3] }
  0x34   : > { %v704_v56 = vpack.c.bf16 %v692_v49, %v690_v48  ;;  %v437_v52 = vmul.f32 %v401_v50, %v364_v44  ;;  %v520_v57 = vperm.slane %v892_v7, 1  ;;  %v600_v53 = vunpack.c.h.bf16 %v1133_v8 }
  0x35   : > { %v453_v59 = vadd.f32 %v435_v38, %v334_v42  ;;  %v554_v60 = vmul.f32 %v518_v55, %v481_v46  ;;  %v602_v61 = vunpack.c.h.bf16 %v1136_v13  ;;  %v637_v62 = vperm.slane %v909_v14, 1 }
  0x36   : > { %727 = vmatpush.bf16.msra.mxu0 %v704_v56  ;;  %v455_v1 = vadd.f32 %v437_v52, %v336_v41  ;;  %v556_v2 = vmul.f32 %v520_v57, %v483_v51  ;;  %v639_v3 = vperm.slane %v910_v19, 1  ;;  %v257_v4 = vunpack.c.l.bf16 %v1150_v47  ;;  %v890_v19 = vld [vmem:[%s1019_s23 + $0x2a] sm:$0x3] }
  0x37   : > { %v572_v7 = vadd.f32 %v554_v60, %v453_v59  ;;  %v673_v8 = vmul.f32 %v637_v62, %v600_v53  ;;  %v259_v9 = vunpack.c.l.bf16 %v1154_v54  ;;  %v293_v10 = vperm.slane %v1157_v58, 0 }
  0x38   : > { %v574_v13 = vadd.f32 %v556_v2, %v455_v1  ;;  %v675_v14 = vmul.f32 %v639_v3, %v602_v61  ;;  %v295_v15 = vperm.slane %v274_v63, 0  ;;  %v357_v16 = vunpack.c.l.bf16 %v1162_v0 }
  0x39   : > { %v691_v21 = vadd.f32 %v673_v8, %v572_v7  ;;  %v329_v22 = vmul.f32 %v293_v10, %v257_v4  ;;  %v359_v23 = vunpack.c.l.bf16 %v1166_v5  ;;  %v394_v24 = vperm.slane %v871_v6, 0  ;;  %v1203_v4 = vld [vmem:[%s1014_s20] sm:$0xff] }
  0x3a   : > { %v693_v29 = vadd.f32 %v675_v14, %v574_v13  ;;  %v331_v30 = vmul.f32 %v295_v15, %v259_v9  ;;  %v396_v33 = vperm.slane %v872_v11, 0  ;;  %v476_v34 = vunpack.c.l.bf16 %v1173_v12  ;;  %v271_v10 = vld [vmem:[%s1019_s23] sm:$0x3] }
  0x3b   : > { %v430_v35 = vmul.f32 %v394_v24, %v357_v16  ;;  %v478_v36 = vunpack.c.l.bf16 %v1177_v17  ;;  %v513_v25 = vperm.slane %v889_v18, 0  ;;  %v515_v26 = vperm.slane %v890_v19, 0  ;;  %v1214_v16 = vld [vmem:[%s1014_s20 + $0x48] sm:$0xff]  ;;  %v870_v24 = vld [vmem:[%s1019_s23 + $0x14] sm:$0x3] }
  0x3c   : > { %v705_v40 = vpack.c.bf16 %v693_v29, %v691_v21  ;;  %v432_v31 = vmul.f32 %v396_v33, %v359_v23  ;;  %v595_v32 = vunpack.c.l.bf16 %v1183_v27  ;;  %v597_v37 = vunpack.c.l.bf16 %v1186_v28  ;;  %v878_v33 = vld [vmem:[%s1014_s20 + $0x90] sm:$0xff] }
  0x3d   : > { %v448_v42 = vadd.f32 %v430_v35, %v329_v22  ;;  %v549_v43 = vmul.f32 %v513_v25, %v476_v34  ;;  %v551_v44 = vmul.f32 %v515_v26, %v478_v36  ;;  %v632_v45 = vperm.slane %v907_v20, 0  ;;  %v1226_v34 = vld [vmem:[%s1014_s20 + $0x98] sm:$0xff]  ;;  %v887_v26 = vld [vmem:[%s1019_s23 + $0x24] sm:$0x3] }
  0x3e   : > { %740 = vmatpush.bf16.msra.mxu1 %v705_v40  ;;  %v450_v48 = vadd.f32 %v432_v31, %v331_v30  ;;  %v634_v49 = vperm.slane %v908_v39, 0  ;;  %v258_v41 = vunpack.c.h.bf16 %v1150_v47  ;;  %v260_v50 = vunpack.c.h.bf16 %v1154_v54  ;;  %v896_v40 = vld [vmem:[%s1014_s20 + $0xd8] sm:$0xff] }
  0x3f   : > { %v567_v38 = vadd.f32 %v549_v43, %v448_v42  ;;  %v668_v46 = vmul.f32 %v632_v45, %v595_v32  ;;  %v294_v51 = vperm.slane %v1157_v58, 1  ;;  %v296_v55 = vperm.slane %v274_v63, 1  ;;  %v897_v43 = vld [vmem:[%s1014_s20 + $0xe0] sm:$0xff] }
  0x40   : > { %v569_v56 = vadd.f32 %v551_v44, %v450_v48  ;;  %v670_v52 = vmul.f32 %v634_v49, %v597_v37  ;;  %v358_v57 = vunpack.c.h.bf16 %v1162_v0  ;;  %v360_v53 = vunpack.c.h.bf16 %v1166_v5  ;;  %v1206_v5 = vld [vmem:[%s1014_s20 + $0x8] sm:$0xff]  ;;  %v905_v44 = vld [vmem:[%s1019_s23 + $0x36] sm:$0x3] }
  0x41   : > { %v686_v59 = vadd.f32 %v668_v46, %v567_v38  ;;  %v330_v60 = vmul.f32 %v294_v51, %v258_v41  ;;  %v332_v61 = vmul.f32 %v296_v55, %v260_v50  ;;  %v395_v47 = vperm.slane %v871_v6, 1  ;;  %v906_v50 = vld [vmem:[%s1019_s23 + $0x38] sm:$0x3] }
  0x42   : > { %v688_v54 = vadd.f32 %v670_v52, %v569_v56  ;;  %v397_v62 = vperm.slane %v872_v11, 1  ;;  %v477_v1 = vunpack.c.h.bf16 %v1173_v12  ;;  %v479_v58 = vunpack.c.h.bf16 %v1177_v17  ;;  %v1211_v11 = vld [vmem:[%s1019_s23 + $0x2] sm:$0x3]  ;;  %v1217_v17 = vld [vmem:[%s1014_s20 + $0x50] sm:$0xff] }
  0x43   : > { %v431_v63 = vmul.f32 %v395_v47, %v358_v57  ;;  %v514_v2 = vperm.slane %v889_v18, 1  ;;  %v516_v3 = vperm.slane %v890_v19, 1  ;;  %v596_v0 = vunpack.c.h.bf16 %v1183_v27  ;;  %v869_v18 = vld [vmem:[%s1019_s23 + $0x12] sm:$0x3] }
  0x44   : > { %v702_v6 = vpack.c.bf16 %v688_v54, %v686_v59  ;;  %v433_v7 = vmul.f32 %v397_v62, %v360_v53  ;;  %v598_v8 = vunpack.c.h.bf16 %v1186_v28  ;;  %v633_v9 = vperm.slane %v907_v20, 1 }
  0x45   : > { %v449_v12 = vadd.f32 %v431_v63, %v330_v60  ;;  %v550_v13 = vmul.f32 %v514_v2, %v477_v1  ;;  %v552_v14 = vmul.f32 %v516_v3, %v479_v58  ;;  %v635_v15 = vperm.slane %v908_v39, 1  ;;  %v888_v39 = vld [vmem:[%s1019_s23 + $0x26] sm:$0x3] }
  0x46   : > { %728 = vmatpush.bf16.msra.mxu0 %v702_v6  ;;  %v451_v19 = vadd.f32 %v433_v7, %v332_v61  ;;  %v669_v21 = vmul.f32 %v633_v9, %v596_v0  ;;  %v253_v22 = vunpack.c.l.bf16 %v1203_v4  ;;  %v255_v23 = vunpack.c.l.bf16 %v1206_v5 }
  0x47   : > { %v568_v27 = vadd.f32 %v550_v13, %v449_v12  ;;  %v671_v28 = vmul.f32 %v635_v15, %v598_v8  ;;  %v289_v29 = vperm.slane %v271_v10, 0  ;;  %v291_v30 = vperm.slane %v1211_v11, 0 }
  0x48   : > { %v570_v20 = vadd.f32 %v552_v14, %v451_v19  ;;  %v353_v35 = vunpack.c.l.bf16 %v1214_v16  ;;  %v355_v36 = vunpack.c.l.bf16 %v1217_v17  ;;  %v390_v25 = vperm.slane %v869_v18, 0 }
  0x49   : > { %v687_v31 = vadd.f32 %v669_v21, %v568_v27  ;;  %v325_v32 = vmul.f32 %v289_v29, %v253_v22  ;;  %v327_v37 = vmul.f32 %v291_v30, %v255_v23  ;;  %v392_v42 = vperm.slane %v870_v24, 0 }
  0x4a   : > { %v689_v45 = vadd.f32 %v671_v28, %v570_v20  ;;  %v426_v48 = vmul.f32 %v390_v25, %v353_v35  ;;  %v472_v49 = vunpack.c.l.bf16 %v878_v33  ;;  %v474_v41 = vunpack.c.l.bf16 %v1226_v34 }
  0x4b   : > { %v428_v38 = vmul.f32 %v392_v42, %v355_v36  ;;  %v509_v46 = vperm.slane %v887_v26, 0  ;;  %v511_v51 = vperm.slane %v888_v39, 0  ;;  %v591_v55 = vunpack.c.l.bf16 %v896_v40 }
  0x4c   : > { %v703_v56 = vpack.c.bf16 %v689_v45, %v687_v31  ;;  %v444_v52 = vadd.f32 %v426_v48, %v325_v32  ;;  %v593_v57 = vunpack.c.l.bf16 %v897_v43  ;;  %v628_v53 = vperm.slane %v905_v44, 0 }
  0x4d   : > { %v446_v59 = vadd.f32 %v428_v38, %v327_v37  ;;  %v545_v60 = vmul.f32 %v509_v46, %v472_v49  ;;  %v547_v61 = vmul.f32 %v511_v51, %v474_v41  ;;  %v630_v47 = vperm.slane %v906_v50, 0 }
  0x4e   : > { %741 = vmatpush.bf16.msra.mxu1 %v703_v56  ;;  %v664_v54 = vmul.f32 %v628_v53, %v591_v55  ;;  %v254_v62 = vunpack.c.h.bf16 %v1203_v4  ;;  %v256_v1 = vunpack.c.h.bf16 %v1206_v5  ;;  %v290_v58 = vperm.slane %v271_v10, 1 }
  0x4f   : > { %v563_v63 = vadd.f32 %v545_v60, %v444_v52  ;;  %v565_v2 = vadd.f32 %v547_v61, %v446_v59  ;;  %v666_v3 = vmul.f32 %v630_v47, %v593_v57  ;;  %v292_v0 = vperm.slane %v1211_v11, 1 }
  0x50   : > { %v326_v6 = vmul.f32 %v290_v58, %v254_v62  ;;  %v354_v7 = vunpack.c.h.bf16 %v1214_v16  ;;  %v356_v8 = vunpack.c.h.bf16 %v1217_v17  ;;  %v391_v9 = vperm.slane %v869_v18, 1 }
  0x51   : > { %v682_v12 = vadd.f32 %v664_v54, %v563_v63  ;;  %v684_v13 = vadd.f32 %v666_v3, %v565_v2  ;;  %v328_v14 = vmul.f32 %v292_v0, %v256_v1  ;;  %v393_v15 = vperm.slane %v870_v24, 1  ;;  %v710_v24 = vld [vmem:[%s1261_s2] sm:$0xf] }
  0x52   : > { %v427_v19 = vmul.f32 %v391_v9, %v354_v7  ;;  %v473_v4 = vunpack.c.h.bf16 %v878_v33  ;;  %v475_v5 = vunpack.c.h.bf16 %v1226_v34  ;;  %v510_v10 = vperm.slane %v887_v26, 1 }
  0x53   : > { %v700_v21 = vpack.c.bf16 %v684_v13, %v682_v12  ;;  %v429_v22 = vmul.f32 %v393_v15, %v356_v8  ;;  %v512_v23 = vperm.slane %v888_v39, 1  ;;  %v592_v27 = vunpack.c.h.bf16 %v896_v40 }
  0x54   : > { %v445_v11 = vadd.f32 %v427_v19, %v326_v6  ;;  %v546_v28 = vmul.f32 %v510_v10, %v473_v4  ;;  %v594_v29 = vunpack.c.h.bf16 %v897_v43  ;;  %v629_v16 = vperm.slane %v905_v44, 1 }
  0x55   : > { %729 = vmatpush.bf16.msra.mxu0 %v700_v21  ;;  %v447_v17 = vadd.f32 %v429_v22, %v328_v14  ;;  %v548_v18 = vmul.f32 %v512_v23, %v475_v5  ;;  %v631_v30 = vperm.slane %v906_v50, 1 }
  0x56   : > { %v564_v33 = vadd.f32 %v546_v28, %v445_v11  ;;  %v665_v34 = vmul.f32 %v629_v16, %v592_v27 }
  0x57   : > { %v566_v20 = vadd.f32 %v548_v18, %v447_v17  ;;  %v667_v35 = vmul.f32 %v631_v30, %v594_v29 }
  0x58   : > { %v683_v36 = vadd.f32 %v665_v34, %v564_v33  ;;  %914 = vmatmul.msk.bf16.vlgmr.msra.gmra.mxu0 %vm711_vm1, %v710_v24 }
  0x59   : > { %v685_v25 = vadd.f32 %v667_v35, %v566_v20 }
  0x5b   : > { %v701_v26 = vpack.c.bf16 %v685_v25, %v683_v36 }
  0x5d   : > { %742 = vmatpush.bf16.msra.mxu1 %v701_v26 }
  0x60   : > { %915 = vmatmul.msk.bf16.vlgmr.msra.gmra.mxu1 %vm711_vm1, %v710_v24 }
  0xd5   : > { %v731_v39 = vpop.f32.mrf.mxu0 }
  0xd6   : > { %748 = vst [vmem:[%s241_s29] sm:$0xff] %v731_v39 }
  0xdd   : > { %v744_v40 = vpop.f32.mrf.mxu1  ;;  %v733_v31 = vpop.f32.mrf.mxu0 }
  0xde   : > { %749 = vst [vmem:[%s241_s29 + $0x8] sm:$0xff] %v744_v40 }
  0xe5   : > { %v746_v32 = vpop.f32.mrf.mxu1 }
  0xe6 PF: > { %s13_s14 = sadd.s32 1, %s967_s14   ;;  %s1263_s12 = smov %s963_s13 }
  0xe7   : > { %p10_p5 = scmp.ge.s32.totalorder %s13_s14, 4   ;;  %s1264_s13 = smov %s1266_s15 }
  0xe9   :  { %12 = sbr.rel (!%p10_p5) target bundleno = 2 (0x2), region = 71 }

</bundles_post_ra>
